<compile_context>
chip_gen: v7x
topology: tpu7x:2x2x1
jax: 0.10.0
libtpu: 0.0.40
codegen_flags: <defaults>
</compile_context>

<pallas_src>
import jax
import jax.numpy as jnp
from jax.experimental import pallas as pl
from jax.experimental.pallas import tpu as pltpu

# Separable factorizations (outer product v ⊗ h) of the module's kernels:
#   x = [[1,0,-1],[2,0,-2],[1,0,-1]] = [1,2,1]^T @ [1,0,-1]
#   y = x.T = [[1,2,1],[0,0,0],[-1,-2,-1]] = [1,0,-1]^T @ [1,2,1]
_SEPARABLE = {
    "x": ((1.0, 2.0, 1.0), (1.0, 0.0, -1.0)),
    "y": ((1.0, 0.0, -1.0), (1.0, 2.0, 1.0)),
}


def _wsum(terms):
    """Weighted sum of equal-shape arrays; skips zero weights, avoids useless multiplies."""
    acc = None
    for w, a in terms:
        if w == 0.0:
            continue
        t = a if w == 1.0 else (-a if w == -1.0 else a * w)
        acc = t if acc is None else acc + t
    return acc


def _make_sobel_loss_kernel(vker, hker, H, W, inv_count):
    v0, v1, v2 = vker
    h0, h1, h2 = hker

    def habs_sum(V):
        """sum |horizontal [h0,h1,h2] pass of V| with the padding=1 zero halo on W."""
        Wd = V.shape[-1]
        left = _wsum([(h1, V[:, :, 0:1]), (h2, V[:, :, 1:2])])                   # col 0
        mid = _wsum([(h0, V[:, :, 0:Wd - 2]),                                    # cols 1..W-2
                     (h1, V[:, :, 1:Wd - 1]),
                     (h2, V[:, :, 2:Wd])])
        right = _wsum([(h0, V[:, :, Wd - 2:Wd - 1]), (h1, V[:, :, Wd - 1:Wd])])  # col W-1
        return (jnp.sum(jnp.abs(left)) + jnp.sum(jnp.abs(mid))
                + jnp.sum(jnp.abs(right)))

    def kernel(t_ref, p_ref, out_ref):
        i = pl.program_id(0)

        @pl.when(i == 0)
        def _():
            out_ref[0, 0] = 0.0

        # Linearity of the convolution: sobel(t) - sobel(p) == sobel(t - p).
        d = t_ref[...].astype(jnp.float32) - p_ref[...].astype(jnp.float32)     # (BB, H, W)

        # Vertical separable pass [v0,v1,v2] with the padding=1 zero halo on H:
        v_top = _wsum([(v1, d[:, 0:1, :]), (v2, d[:, 1:2, :])])                 # row 0
        v_mid = _wsum([(v0, d[:, 0:H - 2, :]),                                  # rows 1..H-2
                       (v1, d[:, 1:H - 1, :]),
                       (v2, d[:, 2:H, :])])
        v_bot = _wsum([(v0, d[:, H - 2:H - 1, :]), (v1, d[:, H - 1:H, :])])     # row H-1

        s = habs_sum(v_top) + habs_sum(v_mid) + habs_sum(v_bot)
        out_ref[0, 0] += s

        @pl.when(i == pl.num_programs(0) - 1)
        def _():
            out_ref[0, 0] = out_ref[0, 0] * inv_count                           # L1 mean

    return kernel


def sobel_loss(target, prediction, direction="x"):
    """Pallas equivalent of Sobel_Loss.forward(target, prediction, direction)."""
    N, C, H, W = target.shape
    assert C == 1, "Sobel_Loss conv weight is (1,1,3,3) => single input channel"
    assert H >= 3 and W >= 3, "3x3 Sobel stencil needs H, W >= 3"
    B = N * C

    # No padding, no dtype copy: reshape only (free view), cast happens in-kernel.
    t = target.reshape(B, H, W)
    p = prediction.reshape(B, H, W)

    # Batch BB images per grid step: largest divisor of B whose per-input block stays
    # under ~2 MiB (2 inputs x 2 pipeline buffers + in-kernel f32 temporaries << 32 MiB VMEM).
    itemsize = jnp.dtype(target.dtype).itemsize
    cap = max(1, (2 * 1024 * 1024) // (H * W * itemsize))
    bb = 1
    for cand in range(1, min(B, cap) + 1):
        if B % cand == 0:
            bb = cand
    grid = (B // bb,)

    vker, hker = _SEPARABLE["x" if direction == "x" else "y"]
    inv_count = 1.0 / float(B * H * W)   # conv output has shape (N, 1, H, W)

    kernel = _make_sobel_loss_kernel(vker, hker, H, W, inv_count)

    out = pl.pallas_call(
        kernel,
        out_shape=jax.ShapeDtypeStruct((1, 1), jnp.float32),
        grid=grid,
        in_specs=[
            pl.BlockSpec((bb, H, W), lambda i: (i, 0, 0)),
            pl.BlockSpec((bb, H, W), lambda i: (i, 0, 0)),
        ],
        out_specs=pl.BlockSpec((1, 1), lambda i: (0, 0),
                               memory_space=pltpu.SMEM),
        compiler_params=pltpu.CompilerParams(
            # Accumulating (1,1) output across the batch axis => serial axis.
            dimension_semantics=("arbitrary",),
            vmem_limit_bytes=32 * 1024 * 1024,
        ),
    )(t, p)
    return out[0, 0]


def _reference_sobel_loss(target, prediction, direction="x"):
    """Pure-jnp reference (full 3x3 conv on padded inputs, then L1 mean)."""
    kx = jnp.array([[1., 0., -1.], [2., 0., -2.], [1., 0., -1.]], jnp.float32)
    k = kx if direction == "x" else kx.T
    N, C, H, W = target.shape

    def conv(x):
        xp = jnp.pad(x.astype(jnp.float32), ((0, 0), (0, 0), (1, 1), (1, 1)))
        acc = jnp.zeros((N, C, H, W), jnp.float32)
        for dh in range(3):
            for dw in range(3):
                acc = acc + k[dh, dw] * xp[:, :, dh:dh + H, dw:dw + W]
        return acc

    return jnp.mean(jnp.abs(conv(target) - conv(prediction)))


if __name__ == "__main__":
    key = jax.random.PRNGKey(0)
    k1, k2 = jax.random.split(key)
    # NCHW, C must be 1 (conv weight is (1,1,3,3))
    target = jax.random.normal(k1, (2, 1, 16, 16), dtype=jnp.float32)
    prediction = jax.random.normal(k2, (2, 1, 16, 16), dtype=jnp.float32)

    loss_x = jax.block_until_ready(sobel_loss(target, prediction, direction="x"))
    loss_y = jax.block_until_ready(sobel_loss(target, prediction, direction="y"))

    ref_x = _reference_sobel_loss(target, prediction, "x")
    ref_y = _reference_sobel_loss(target, prediction, "y")
    assert jnp.allclose(loss_x, ref_x, rtol=1e-4, atol=1e-4), (loss_x, ref_x)
    assert jnp.allclose(loss_y, ref_y, rtol=1e-4, atol=1e-4), (loss_y, ref_y)

    print("KERNEL_OK")
</pallas_src>

<mosaic_0001>
module attributes {stable_mosaic.version = 11 : i64} {
  func.func @kernel(%arg0: i32, %arg1: memref<2x16x16xf32, #tpu.memory_space<vmem>>, %arg2: memref<2x16x16xf32, #tpu.memory_space<vmem>>, %arg3: memref<1x1xf32, #tpu.memory_space<smem>>) attributes {dimension_semantics = [#tpu.dimension_semantics<arbitrary>], iteration_bounds = array<i64: 1>, scalar_prefetch = 0 : i64, scratch_operands = 0 : i64, tpu.core_type = #tpu.core_type<tc>, window_params = [{transform_indices = @transform_0, window_bounds = array<i64: 2, 16, 16>}, {transform_indices = @transform_1, window_bounds = array<i64: 2, 16, 16>}, {transform_indices = @transform_2, window_bounds = array<i64: 1, 1>}]} {
    %c0_i32 = arith.constant 0 : i32
    %0 = arith.cmpi eq, %arg0, %c0_i32 : i32
    %1 = arith.extui %0 : i1 to i32
    %c0_i32_0 = arith.constant 0 : i32
    %2 = arith.cmpi ne, %1, %c0_i32_0 : i32
    scf.if %2 {
      %cst_29 = arith.constant 0.000000e+00 : f32
      %c0_30 = arith.constant 0 : index
      %c0_31 = arith.constant 0 : index
      %109 = memref.load %arg3[%c0_30, %c0_31] : memref<1x1xf32, #tpu.memory_space<smem>>
      memref.store %cst_29, %arg3[%c0_30, %c0_31] : memref<1x1xf32, #tpu.memory_space<smem>>
    } else {
    }
    %c0 = arith.constant 0 : index
    %c0_1 = arith.constant 0 : index
    %c0_2 = arith.constant 0 : index
    %3 = vector.load %arg1[%c0, %c0_1, %c0_2] : memref<2x16x16xf32, #tpu.memory_space<vmem>>, vector<2x16x16xf32>
    %c0_3 = arith.constant 0 : index
    %c0_4 = arith.constant 0 : index
    %c0_5 = arith.constant 0 : index
    %4 = vector.load %arg2[%c0_3, %c0_4, %c0_5] : memref<2x16x16xf32, #tpu.memory_space<vmem>>, vector<2x16x16xf32>
    %5 = arith.subf %3, %4 : vector<2x16x16xf32>
    %6 = vector.extract_strided_slice %5 {offsets = [0, 0, 0], sizes = [2, 1, 16], strides = [1, 1, 1]} : vector<2x16x16xf32> to vector<2x1x16xf32>
    %7 = vector.extract_strided_slice %5 {offsets = [0, 1, 0], sizes = [2, 1, 16], strides = [1, 1, 1]} : vector<2x16x16xf32> to vector<2x1x16xf32>
    %cst = arith.constant 2.000000e+00 : f32
    %8 = vector.broadcast %cst : f32 to vector<2x1x16xf32>
    %9 = arith.mulf %6, %8 : vector<2x1x16xf32>
    %10 = arith.addf %9, %7 : vector<2x1x16xf32>
    %11 = vector.extract_strided_slice %5 {offsets = [0, 0, 0], sizes = [2, 14, 16], strides = [1, 1, 1]} : vector<2x16x16xf32> to vector<2x14x16xf32>
    %12 = vector.extract_strided_slice %5 {offsets = [0, 1, 0], sizes = [2, 14, 16], strides = [1, 1, 1]} : vector<2x16x16xf32> to vector<2x14x16xf32>
    %13 = vector.extract_strided_slice %5 {offsets = [0, 2, 0], sizes = [2, 14, 16], strides = [1, 1, 1]} : vector<2x16x16xf32> to vector<2x14x16xf32>
    %cst_6 = arith.constant 2.000000e+00 : f32
    %14 = vector.broadcast %cst_6 : f32 to vector<2x14x16xf32>
    %15 = arith.mulf %12, %14 : vector<2x14x16xf32>
    %16 = arith.addf %11, %15 : vector<2x14x16xf32>
    %17 = arith.addf %16, %13 : vector<2x14x16xf32>
    %18 = vector.extract_strided_slice %5 {offsets = [0, 14, 0], sizes = [2, 1, 16], strides = [1, 1, 1]} : vector<2x16x16xf32> to vector<2x1x16xf32>
    %19 = vector.extract_strided_slice %5 {offsets = [0, 15, 0], sizes = [2, 1, 16], strides = [1, 1, 1]} : vector<2x16x16xf32> to vector<2x1x16xf32>
    %cst_7 = arith.constant 2.000000e+00 : f32
    %20 = vector.broadcast %cst_7 : f32 to vector<2x1x16xf32>
    %21 = arith.mulf %19, %20 : vector<2x1x16xf32>
    %22 = arith.addf %18, %21 : vector<2x1x16xf32>
    %23 = vector.extract_strided_slice %10 {offsets = [0, 0, 1], sizes = [2, 1, 1], strides = [1, 1, 1]} : vector<2x1x16xf32> to vector<2x1x1xf32>
    %cst_8 = arith.constant 0.000000e+00 : f32
    %24 = vector.broadcast %cst_8 : f32 to vector<2x1x1xf32>
    %25 = arith.subf %24, %23 : vector<2x1x1xf32>
    %26 = vector.extract_strided_slice %10 {offsets = [0, 0, 0], sizes = [2, 1, 14], strides = [1, 1, 1]} : vector<2x1x16xf32> to vector<2x1x14xf32>
    %27 = vector.extract_strided_slice %10 {offsets = [0, 0, 2], sizes = [2, 1, 14], strides = [1, 1, 1]} : vector<2x1x16xf32> to vector<2x1x14xf32>
    %cst_9 = arith.constant 0.000000e+00 : f32
    %28 = vector.broadcast %cst_9 : f32 to vector<2x1x14xf32>
    %29 = arith.subf %28, %27 : vector<2x1x14xf32>
    %30 = arith.addf %26, %29 : vector<2x1x14xf32>
    %31 = vector.extract_strided_slice %10 {offsets = [0, 0, 14], sizes = [2, 1, 1], strides = [1, 1, 1]} : vector<2x1x16xf32> to vector<2x1x1xf32>
    %32 = math.absf %25 : vector<2x1x1xf32>
    %33 = vector.shape_cast %32 : vector<2x1x1xf32> to vector<1x2x1x1xf32>
    %cst_10 = arith.constant dense<0.000000e+00> : vector<1xf32>
    %34 = vector.multi_reduction <add>, %33, %cst_10 [1, 2, 3] : vector<1x2x1x1xf32> to vector<1xf32>
    %35 = vector.shape_cast %34 : vector<1xf32> to vector<1x1x1x1xf32>
    %36 = vector.extract %35[0, 0, 0, 0] : f32 from vector<1x1x1x1xf32>
    %37 = math.absf %30 : vector<2x1x14xf32>
    %38 = vector.shape_cast %37 : vector<2x1x14xf32> to vector<1x2x1x14xf32>
    %cst_11 = arith.constant dense<0.000000e+00> : vector<1xf32>
    %39 = vector.multi_reduction <add>, %38, %cst_11 [1, 2, 3] : vector<1x2x1x14xf32> to vector<1xf32>
    %40 = vector.shape_cast %39 : vector<1xf32> to vector<1x1x1x1xf32>
    %41 = vector.extract %40[0, 0, 0, 0] : f32 from vector<1x1x1x1xf32>
    %42 = arith.addf %36, %41 : f32
    %43 = math.absf %31 : vector<2x1x1xf32>
    %44 = vector.shape_cast %43 : vector<2x1x1xf32> to vector<1x2x1x1xf32>
    %cst_12 = arith.constant dense<0.000000e+00> : vector<1xf32>
    %45 = vector.multi_reduction <add>, %44, %cst_12 [1, 2, 3] : vector<1x2x1x1xf32> to vector<1xf32>
    %46 = vector.shape_cast %45 : vector<1xf32> to vector<1x1x1x1xf32>
    %47 = vector.extract %46[0, 0, 0, 0] : f32 from vector<1x1x1x1xf32>
    %48 = arith.addf %42, %47 : f32
    %49 = vector.extract_strided_slice %17 {offsets = [0, 0, 1], sizes = [2, 14, 1], strides = [1, 1, 1]} : vector<2x14x16xf32> to vector<2x14x1xf32>
    %cst_13 = arith.constant 0.000000e+00 : f32
    %50 = vector.broadcast %cst_13 : f32 to vector<2x14x1xf32>
    %51 = arith.subf %50, %49 : vector<2x14x1xf32>
    %52 = vector.extract_strided_slice %17 {offsets = [0, 0, 0], sizes = [2, 14, 14], strides = [1, 1, 1]} : vector<2x14x16xf32> to vector<2x14x14xf32>
    %53 = vector.extract_strided_slice %17 {offsets = [0, 0, 2], sizes = [2, 14, 14], strides = [1, 1, 1]} : vector<2x14x16xf32> to vector<2x14x14xf32>
    %cst_14 = arith.constant 0.000000e+00 : f32
    %54 = vector.broadcast %cst_14 : f32 to vector<2x14x14xf32>
    %55 = arith.subf %54, %53 : vector<2x14x14xf32>
    %56 = arith.addf %52, %55 : vector<2x14x14xf32>
    %57 = vector.extract_strided_slice %17 {offsets = [0, 0, 14], sizes = [2, 14, 1], strides = [1, 1, 1]} : vector<2x14x16xf32> to vector<2x14x1xf32>
    %58 = math.absf %51 : vector<2x14x1xf32>
    %59 = vector.shape_cast %58 : vector<2x14x1xf32> to vector<1x2x14x1xf32>
    %cst_15 = arith.constant dense<0.000000e+00> : vector<1xf32>
    %60 = vector.multi_reduction <add>, %59, %cst_15 [1, 2, 3] : vector<1x2x14x1xf32> to vector<1xf32>
    %61 = vector.shape_cast %60 : vector<1xf32> to vector<1x1x1x1xf32>
    %62 = vector.extract %61[0, 0, 0, 0] : f32 from vector<1x1x1x1xf32>
    %63 = math.absf %56 : vector<2x14x14xf32>
    %64 = vector.shape_cast %63 : vector<2x14x14xf32> to vector<1x2x14x14xf32>
    %cst_16 = arith.constant dense<0.000000e+00> : vector<1xf32>
    %65 = vector.multi_reduction <add>, %64, %cst_16 [1, 2, 3] : vector<1x2x14x14xf32> to vector<1xf32>
    %66 = vector.shape_cast %65 : vector<1xf32> to vector<1x1x1x1xf32>
    %67 = vector.extract %66[0, 0, 0, 0] : f32 from vector<1x1x1x1xf32>
    %68 = arith.addf %62, %67 : f32
    %69 = math.absf %57 : vector<2x14x1xf32>
    %70 = vector.shape_cast %69 : vector<2x14x1xf32> to vector<1x2x14x1xf32>
    %cst_17 = arith.constant dense<0.000000e+00> : vector<1xf32>
    %71 = vector.multi_reduction <add>, %70, %cst_17 [1, 2, 3] : vector<1x2x14x1xf32> to vector<1xf32>
    %72 = vector.shape_cast %71 : vector<1xf32> to vector<1x1x1x1xf32>
    %73 = vector.extract %72[0, 0, 0, 0] : f32 from vector<1x1x1x1xf32>
    %74 = arith.addf %68, %73 : f32
    %75 = arith.addf %48, %74 : f32
    %76 = vector.extract_strided_slice %22 {offsets = [0, 0, 1], sizes = [2, 1, 1], strides = [1, 1, 1]} : vector<2x1x16xf32> to vector<2x1x1xf32>
    %cst_18 = arith.constant 0.000000e+00 : f32
    %77 = vector.broadcast %cst_18 : f32 to vector<2x1x1xf32>
    %78 = arith.subf %77, %76 : vector<2x1x1xf32>
    %79 = vector.extract_strided_slice %22 {offsets = [0, 0, 0], sizes = [2, 1, 14], strides = [1, 1, 1]} : vector<2x1x16xf32> to vector<2x1x14xf32>
    %80 = vector.extract_strided_slice %22 {offsets = [0, 0, 2], sizes = [2, 1, 14], strides = [1, 1, 1]} : vector<2x1x16xf32> to vector<2x1x14xf32>
    %cst_19 = arith.constant 0.000000e+00 : f32
    %81 = vector.broadcast %cst_19 : f32 to vector<2x1x14xf32>
    %82 = arith.subf %81, %80 : vector<2x1x14xf32>
    %83 = arith.addf %79, %82 : vector<2x1x14xf32>
    %84 = vector.extract_strided_slice %22 {offsets = [0, 0, 14], sizes = [2, 1, 1], strides = [1, 1, 1]} : vector<2x1x16xf32> to vector<2x1x1xf32>
    %85 = math.absf %78 : vector<2x1x1xf32>
    %86 = vector.shape_cast %85 : vector<2x1x1xf32> to vector<1x2x1x1xf32>
    %cst_20 = arith.constant dense<0.000000e+00> : vector<1xf32>
    %87 = vector.multi_reduction <add>, %86, %cst_20 [1, 2, 3] : vector<1x2x1x1xf32> to vector<1xf32>
    %88 = vector.shape_cast %87 : vector<1xf32> to vector<1x1x1x1xf32>
    %89 = vector.extract %88[0, 0, 0, 0] : f32 from vector<1x1x1x1xf32>
    %90 = math.absf %83 : vector<2x1x14xf32>
    %91 = vector.shape_cast %90 : vector<2x1x14xf32> to vector<1x2x1x14xf32>
    %cst_21 = arith.constant dense<0.000000e+00> : vector<1xf32>
    %92 = vector.multi_reduction <add>, %91, %cst_21 [1, 2, 3] : vector<1x2x1x14xf32> to vector<1xf32>
    %93 = vector.shape_cast %92 : vector<1xf32> to vector<1x1x1x1xf32>
    %94 = vector.extract %93[0, 0, 0, 0] : f32 from vector<1x1x1x1xf32>
    %95 = arith.addf %89, %94 : f32
    %96 = math.absf %84 : vector<2x1x1xf32>
    %97 = vector.shape_cast %96 : vector<2x1x1xf32> to vector<1x2x1x1xf32>
    %cst_22 = arith.constant dense<0.000000e+00> : vector<1xf32>
    %98 = vector.multi_reduction <add>, %97, %cst_22 [1, 2, 3] : vector<1x2x1x1xf32> to vector<1xf32>
    %99 = vector.shape_cast %98 : vector<1xf32> to vector<1x1x1x1xf32>
    %100 = vector.extract %99[0, 0, 0, 0] : f32 from vector<1x1x1x1xf32>
    %101 = arith.addf %95, %100 : f32
    %102 = arith.addf %75, %101 : f32
    %c0_23 = arith.constant 0 : index
    %c0_24 = arith.constant 0 : index
    %103 = memref.load %arg3[%c0_23, %c0_24] : memref<1x1xf32, #tpu.memory_space<smem>>
    %104 = arith.addf %103, %102 : f32
    %c0_25 = arith.constant 0 : index
    %c0_26 = arith.constant 0 : index
    %105 = memref.load %arg3[%c0_25, %c0_26] : memref<1x1xf32, #tpu.memory_space<smem>>
    memref.store %104, %arg3[%c0_25, %c0_26] : memref<1x1xf32, #tpu.memory_space<smem>>
    %c0_i32_27 = arith.constant 0 : i32
    %106 = arith.cmpi eq, %arg0, %c0_i32_27 : i32
    %107 = arith.extui %106 : i1 to i32
    %c0_i32_28 = arith.constant 0 : i32
    %108 = arith.cmpi ne, %107, %c0_i32_28 : i32
    scf.if %108 {
      %c0_29 = arith.constant 0 : index
      %c0_30 = arith.constant 0 : index
      %109 = memref.load %arg3[%c0_29, %c0_30] : memref<1x1xf32, #tpu.memory_space<smem>>
      %cst_31 = arith.constant 0.001953125 : f32
      %110 = arith.mulf %109, %cst_31 : f32
      %c0_32 = arith.constant 0 : index
      %c0_33 = arith.constant 0 : index
      %111 = memref.load %arg3[%c0_32, %c0_33] : memref<1x1xf32, #tpu.memory_space<smem>>
      memref.store %110, %arg3[%c0_32, %c0_33] : memref<1x1xf32, #tpu.memory_space<smem>>
    } else {
    }
    return
  }
  func.func @transform_0(%arg0: i32) -> (i32, i32, i32) {
    %c0_i32 = arith.constant 0 : i32
    %c0_i32_0 = arith.constant 0 : i32
    %c0_i32_1 = arith.constant 0 : i32
    return %arg0, %c0_i32, %c0_i32_0 : i32, i32, i32
  }
  func.func @transform_1(%arg0: i32) -> (i32, i32, i32) {
    %c0_i32 = arith.constant 0 : i32
    %c0_i32_0 = arith.constant 0 : i32
    %c0_i32_1 = arith.constant 0 : i32
    return %arg0, %c0_i32, %c0_i32_0 : i32, i32, i32
  }
  func.func @transform_2(%arg0: i32) -> (i32, i32) {
    %c0_i32 = arith.constant 0 : i32
    %c0_i32_0 = arith.constant 0 : i32
    %c0_i32_1 = arith.constant 0 : i32
    return %c0_i32, %c0_i32_0 : i32, i32
  }
}

</mosaic_0001>

<bundles_post_ra>
// kernel: tpu_custom_call.1
= control target key start
LH: loop header
LB: loop body
LE: loop exit
PB: predicated region body
PF: predicated region fallthrough
CT: control target
= control target key end

     0   :  { %7 = vsyncpa [#allocation3], 0  ;;  %s643_s0 = inlined_call_operand.hbm [shape: f32[2,16,16], index: 0, kind: input, shape index: {}]   ;;  %s644_s1 = inlined_call_operand.hbm [shape: f32[2,16,16], index: 1, kind: input, shape index: {}]   ;;  %s645_s2 = inlined_call_operand.hbm [shape: f32[1,1], index: 2, kind: output, shape index: {}]  }
   0x1   :  { %8 = vsyncpa [#allocation6], 0 }
   0x2   :  { %9 = vsyncpa [#allocation4], 0  ;;  %s498_s9 = smov [#allocation2]   ;;  %s438_s13 = scalar_lea.hbm %s643_s0, 512 }
   0x3   :  { %s15_s10 = sshll.u32 %s498_s9, 4  ;;  %p439_p0 = scmp.ne.s32.totalorder %s643_s0, %s438_s13  ;;  %s16_s10 = int_to_ptr.vmem [resolvable:$true] %s15_s10 }
   0x4   :  { %p442_p1 = scmp.lt.u32.totalorder %s438_s13, %s643_s0 }
   0x6   :  { %p444_p2 = pnand %p442_p1, %p439_p0 }
   0x8   :  { %447 = shalt.err (!%p444_p2)
}
   0x9   :  { %s448_s18 = scalar_lea.vmem %s16_s10, 512  ;;  %p453_p4 = scmp.lt.s32.totalorder %s16_s10, %s16_s10 }
   0xa   :  { %p449_p3 = scmp.ne.s32.totalorder %s16_s10, %s448_s18  ;;  %p454_p5 = scmp.lt.s32.totalorder %s448_s18, %s448_s18 }
   0xc   :  { %p455_p6 = por %p454_p5, %p453_p4 }
   0xe   :  { %p456_p7 = pnand %p455_p6, %p449_p3 }
  0x10   :  { %459 = shalt.err (!%p456_p7)
}
  0x11   :  { %s499_s19 = smov 128   ;;  %s500_s20 = smov 8  }
  0x12   :  { %21 = dma.hbm_to_vmem [thread:$0]  %s643_s0, 512, %s16_s10, [#allocation3], %s499_s19, %s499_s19, %s500_s20  }
  0x13   :  { %s501_s23 = smov [#allocation5]   ;;  %s460_s27 = scalar_lea.hbm %s644_s1, 512 }
  0x14   :  { %s27_s24 = sshll.u32 %s501_s23, 4  ;;  %p461_p8 = scmp.ne.s32.totalorder %s644_s1, %s460_s27  ;;  %s28_s24 = int_to_ptr.vmem [resolvable:$true] %s27_s24 }
  0x15   :  { %p464_p9 = scmp.lt.u32.totalorder %s460_s27, %s644_s1 }
  0x17   :  { %p466_p10 = pnand %p464_p9, %p461_p8 }
  0x19   :  { %469 = shalt.err (!%p466_p10)
}
  0x1a   :  { %s470_s4 = scalar_lea.vmem %s28_s24, 512  ;;  %p475_p12 = scmp.lt.s32.totalorder %s28_s24, %s28_s24 }
  0x1b   :  { %p471_p11 = scmp.ne.s32.totalorder %s28_s24, %s470_s4  ;;  %p476_p13 = scmp.lt.s32.totalorder %s470_s4, %s470_s4 }
  0x1d   :  { %p477_p0 = por %p476_p13, %p475_p12 }
  0x1f   :  { %p478_p1 = pnand %p477_p0, %p471_p11 }
  0x21   :  { %481 = shalt.err (!%p478_p1)
}
  0x22   :  { %33 = dma.hbm_to_vmem [thread:$0]  %s644_s1, 512, %s28_s24, [#allocation6], %s499_s19, %s499_s19, %s500_s20  }
  0x23   :  { %492 = dma.done.wait [#allocation3], 512  }
  0x24   :  { %493 = vsyncadd [#allocation3], 4294966784 }
  0x25   :  { %494 = dma.done.wait [#allocation6], 512  }
  0x26   :  { %495 = vsyncadd [#allocation6], 4294966784  ;;  %v48_v0 = vld [vmem:[#allocation2 + $0x10] sm:$0xff]  ;;  %v46_v2 = vld [vmem:[#allocation2] sm:$0xff]  ;;  %vm74_vm0 = vcmask 1046528   ;;  %vm91_vm1 = vcmask 1045504  }
  0x27   :  { %v52_v1 = vld [vmem:[#allocation5 + $0x10] sm:$0xff]  ;;  %v50_v4 = vld [vmem:[#allocation5] sm:$0xff]  ;;  %v47_v5 = vld [vmem:[#allocation2 + $0x8] sm:$0xff]  ;;  %s502_s1 = smov 126   ;;  %s503_s6 = smov 127   ;;  %vm143_vm2 = vcmask 106496  }
  0x28   :  { %v56_v3 = vsub.f32 %v48_v0, %v52_v1  ;;  %v51_v6 = vld [vmem:[#allocation5 + $0x8] sm:$0xff]  ;;  %v54_v7 = vsub.f32 %v46_v2, %v50_v4  ;;  %v49_v9 = vld [vmem:[#allocation2 + $0x18] sm:$0xff]  ;;  %s504_s7 = smov 114   ;;  %vm246_vm3 = vcmask 113664   ;;  %vm226_vm4 = vcmask 5120   ;;  %s482_s28 = scalar_lea.hbm %s645_s2, 16 }
  0x29   :  { %v55_v8 = vsub.f32 %v47_v5, %v51_v6  ;;  %v53_v10 = vld [vmem:[#allocation5 + $0x18] sm:$0xff]  ;;  %vm128_vm5 = vcmask 0   ;;  %vm224_vm6 = vcmask 7168   ;;  %vm248_vm7 = vcmask 111616   ;;  %p483_p2 = scmp.ne.s32.totalorder %s645_s2, %s482_s28  ;;  %p486_p3 = scmp.lt.u32.totalorder %s482_s28, %s645_s2 }
  0x2a   :  { %v59_v11 = vmul.f32 2.0, %v56_v3  ;;  %v63_v12 = vrot.slane %v56_v3, 1  ;;  %v57_v13 = vsub.f32 %v49_v9, %v53_v10  ;;  %v58_v14 = vmul.f32 2.0, %v54_v7 }
  0x2b   :  { %v62_v15 = vrot.slane %v54_v7, 1  ;;  %v68_v16 = vmul.f32 2.0, %v55_v8  ;;  %v93_v20 = vrot.slane %v55_v8, 2  ;;  %v92_v24 = vrot.slane %v54_v7, 2  ;;  %p488_p4 = pnand %p486_p3, %p483_p2 }
  0x2c   :  { %v545_v17 = vadd.f32 %v63_v12, %v59_v11  ;;  %v78_v18 = vrot.slane %v59_v11, 1  ;;  %v69_v19 = vmul.f32 2.0, %v57_v13  ;;  %v75_v22 = vrot.slane %v58_v14, 1 }
  0x2d   :  { %v547_v21 = vadd.f32 %v62_v15, %v58_v14  ;;  %v76_v23 = vrot.slane %v68_v16, 1  ;;  %v96_v27 = vrot.slane %v57_v13, 2  ;;  %v95_v28 = vrot.slane %v56_v3, 2 }
  0x2e   :  { %v107_v25 = vsub.f32 0.0, %v545_v17  ;;  %v79_v26 = vrot.slane %v69_v19, 1  ;;  %v94_v37 = vsel %vm91_vm1, %v92_v24, %v93_v20  ;;  %v158_v56 = vand.u32 2147483647, %v545_v17 }
  0x2f   :  { %v106_v29 = vsub.f32 0.0, %v547_v21  ;;  %v551_v30 = vadd.f32 %v76_v23, %v55_v8  ;;  %v77_v31 = vsel %vm74_vm0, %v75_v22, %v76_v23  ;;  %v97_v41 = vsel %vm91_vm1, %v95_v28, %v96_v27 }
  0x30   :  { %112 = vrot.lane.b32.xlu0 %v107_v25, %s502_s1  ;;  %v554_v32 = vadd.f32 %v79_v26, %v57_v13  ;;  %v85_v33 = vadd.f32 %v77_v31, %v54_v7  ;;  %v80_v34 = vsel %vm74_vm0, %v78_v18, %v79_v26  ;;  %v119_v54 = vand.u32 2147483647, %v107_v25 }
  0x31   :  { %110 = vrot.lane.b32.xlu1 %v106_v29, %s502_s1  ;;  %v303_v35 = vsub.f32 0.0, %v551_v30  ;;  %v559_v36 = vadd.f32 %v93_v20, %v551_v30  ;;  %v87_v38 = vadd.f32 %v80_v34, %v56_v3  ;;  %v118_v53 = vand.u32 2147483647, %v106_v29 }
  0x32   :  { %v304_v39 = vsub.f32 0.0, %v554_v32  ;;  %v564_v40 = vadd.f32 %v96_v27, %v554_v32  ;;  %v568_v43 = vadd.f32 %v94_v37, %v85_v33  ;;  %v157_v55 = vand.u32 2147483647, %v547_v21 }
  0x33   :  { %v181_v42 = vsub.f32 0.0, %v559_v36  ;;  %v571_v45 = vadd.f32 %v97_v41, %v87_v38  ;;  %v266_v52 = vand.u32 2147483647, %v559_v36  ;;  %v315_v59 = vand.u32 2147483647, %v303_v35 }
  0x34   :  { %307 = vrot.lane.b32.xlu0 %v303_v35, %s502_s1  ;;  %v183_v44 = vsub.f32 0.0, %v564_v40  ;;  %v180_v46 = vsub.f32 0.0, %v568_v43  ;;  %v265_v49 = vand.u32 2147483647, %v568_v43  ;;  %v268_v60 = vand.u32 2147483647, %v564_v40 }
  0x35   :  { %309 = vrot.lane.b32.xlu1 %v304_v39, %s502_s1  ;;  %v182_v47 = vsub.f32 0.0, %v571_v45  ;;  %v205_v51 = vand.u32 2147483647, %v181_v42  ;;  %v267_v58 = vand.u32 2147483647, %v571_v45  ;;  %v319_v62 = vrot.slane %v315_v59, 6 }
  0x36   :  { %v204_v48 = vand.u32 2147483647, %v180_v46  ;;  %v207_v57 = vand.u32 2147483647, %v183_v44  ;;  %v316_v61 = vand.u32 2147483647, %v304_v39 }
  0x37   :  { %v206_v50 = vand.u32 2147483647, %v182_v47  ;;  %v360_v63 = vand.u32 2147483647, %v551_v30  ;;  %v361_v1 = vand.u32 2147483647, %v554_v32 }
  0x38   :  { %190 = vrot.lane.b32.xlu0 %v181_v42, %s502_s1  ;;  %v320_v0 = vrot.slane %v316_v61, 6 }
  0x39   :  { %194 = vrot.lane.b32.xlu1 %v183_v44, %s502_s1  ;;  %v364_v2 = vrot.slane %v360_v63, 6  ;;  %v365_v3 = vrot.slane %v361_v1, 6 }
  0x3c   :  { %188 = vrot.lane.b32.xlu0 %v180_v46, %s502_s1 }
  0x3d   :  { %192 = vrot.lane.b32.xlu1 %v182_v47, %s502_s1 }
  0x40   :  { %212 = vrot.lane.b32.xlu0 %v204_v48, %s503_s6 }
  0x41   :  { %273 = vrot.lane.b32.xlu1 %v265_v49, %s504_s7 }
  0x44   :  { %216 = vrot.lane.b32.xlu0 %v206_v50, %s503_s6 }
  0x45   :  { %214 = vrot.lane.b32.xlu1 %v205_v51, %s503_s6 }
  0x48   :  { %275 = vrot.lane.b32.xlu0 %v266_v52, %s504_s7 }
  0x49   :  { %122 = vrot.lane.b32.xlu1 %v118_v53, %s503_s6 }
  0x4c   :  { %124 = vrot.lane.b32.xlu0 %v119_v54, %s503_s6 }
  0x4d   :  { %161 = vrot.lane.b32.xlu1 %v157_v55, %s504_s7 }
  0x50   :  { %163 = vrot.lane.b32.xlu0 %v158_v56, %s504_s7 }
  0x51   :  { %218 = vrot.lane.b32.xlu1 %v207_v57, %s503_s6 }
  0x54   :  { %277 = vrot.lane.b32.xlu0 %v267_v58, %s504_s7 }
  0x55   :  { %279 = vrot.lane.b32.xlu1 %v268_v60, %s504_s7 }
  0x58   :  { %321 = vrot.lane.b32.xlu0 %v319_v62, %s503_s6 }
  0x59   :  { %323 = vrot.lane.b32.xlu1 %v320_v0, %s503_s6 }
  0x5c   :  { %366 = vrot.lane.b32.xlu0 %v364_v2, %s504_s7 }
  0x5d   :  { %368 = vrot.lane.b32.xlu1 %v365_v3, %s504_s7 }
  0xa2   :  { %v113_v4 = vpop.permute.xlu0 %112 }
  0xa3   :  { %v117_v5 = vadd.f32 %v113_v4, %v545_v17  ;;  %v111_v6 = vpop.permute.xlu1 %110 }
  0xa4   :  { %v116_v7 = vadd.f32 %v111_v6, %v547_v21 }
  0xa5   :  { %v142_v8 = vand.u32 2147483647, %v117_v5 }
  0xa6   :  { %v141_v9 = vand.u32 2147483647, %v116_v7  ;;  %v308_v10 = vpop.permute.xlu0 %307 }
  0xa7   :  { %v310_v11 = vpop.permute.xlu1 %309  ;;  %v145_v12 = vsel %vm143_vm2, %v142_v8, 0.0  ;;  %v313_v29 = vadd.f32 %v308_v10, %v551_v30 }
  0xa8   :  { %v144_v13 = vsel %vm143_vm2, %v141_v9, 0.0  ;;  %v314_v35 = vadd.f32 %v310_v11, %v554_v32 }
  0xa9   :  { %v146_v14 = vadd.f32 %v145_v12, %v144_v13  ;;  %v339_v44 = vand.u32 2147483647, %v313_v29 }
  0xaa   :  { %v191_v15 = vpop.permute.xlu0 %190  ;;  %v340_v48 = vand.u32 2147483647, %v314_v35 }
  0xab   :  { %v195_v16 = vpop.permute.xlu1 %194  ;;  %147 = vadd.xlane.f32.xlu1 %v146_v14  ;;  %v201_v28 = vadd.f32 %v191_v15, %v559_v36  ;;  %v343_v63 = vrot.slane %v339_v44, 6 }
  0xac   :  { %v203_v54 = vadd.f32 %v195_v16, %v564_v40  ;;  %v344_v2 = vrot.slane %v340_v48, 6 }
  0xad   :  { %v243_v42 = vand.u32 2147483647, %v201_v28 }
  0xae   :  { %v189_v18 = vpop.permute.xlu0 %188  ;;  %v245_v3 = vand.u32 2147483647, %v203_v54 }
  0xaf   :  { %v193_v19 = vpop.permute.xlu1 %192  ;;  %v200_v25 = vadd.f32 %v189_v18, %v568_v43  ;;  %v249_v53 = vsel %vm248_vm7, %v243_v42, 0.0  ;;  %v347_v18 = vsel %vm143_vm2, %v343_v63, 0.0 }
  0xb0   :  { %v202_v33 = vadd.f32 %v193_v19, %v571_v45  ;;  %v253_v14 = vsel %vm248_vm7, %v245_v3, 0.0  ;;  %v348_v19 = vsel %vm143_vm2, %v344_v2, 0.0 }
  0xb1   :  { %v242_v31 = vand.u32 2147483647, %v200_v25 }
  0xb2   :  { %v213_v20 = vpop.permute.xlu0 %212  ;;  %v244_v46 = vand.u32 2147483647, %v202_v33 }
  0xb3   :  { %v274_v17 = vpop.permute.xlu1 %273  ;;  %v247_v45 = vsel %vm246_vm3, %v242_v31, 0.0  ;;  %v225_v58 = vsel %vm224_vm6, %v213_v20, 0.0 }
  0xb4   :  { %v285_v30 = vsel %vm224_vm6, %v274_v17, 0.0  ;;  %v250_v57 = vadd.f32 %v249_v53, %v247_v45  ;;  %v251_v60 = vsel %vm246_vm3, %v244_v46, 0.0  ;;  %v349_v17 = vadd.f32 %v348_v19, %v347_v18 }
  0xb6   :  { %v217_v22 = vpop.permute.xlu0 %216  ;;  %v252_v8 = vadd.f32 %v251_v60, %v250_v57 }
  0xb7   :  { %v215_v23 = vpop.permute.xlu1 %214  ;;  %v229_v5 = vsel %vm224_vm6, %v217_v22, 0.0 }
  0xb8   :  { %v227_v49 = vsel %vm226_vm4, %v215_v23, 0.0  ;;  %v254_v16 = vadd.f32 %v253_v14, %v252_v8 }
  0xb9   :  { %v228_v61 = vadd.f32 %v227_v49, %v225_v58 }
  0xba   :  { %v276_v21 = vpop.permute.xlu0 %275 }
  0xbb   :  { %v123_v24 = vpop.permute.xlu1 %122  ;;  %v286_v37 = vsel %vm226_vm4, %v276_v21, 0.0  ;;  %v230_v10 = vadd.f32 %v229_v5, %v228_v61 }
  0xbc   :  { %v287_v32 = vadd.f32 %v286_v37, %v285_v30  ;;  %v129_v50 = vsel %vm128_vm5, %v123_v24, 0.0 }
  0xbe   :  { %v125_v26 = vpop.permute.xlu0 %124 }
  0xbf   :  { %v162_v27 = vpop.permute.xlu1 %161  ;;  %v130_v43 = vsel %vm128_vm5, %v125_v26, 0.0 }
  0xc0   :  { %v167_v38 = vsel %vm128_vm5, %v162_v27, 0.0  ;;  %v131_v56 = vadd.f32 %v130_v43, %v129_v50 }
  0xc2   :  { %v164_v34 = vpop.permute.xlu0 %163 }
  0xc3   :  { %v168_v39 = vsel %vm128_vm5, %v164_v34, 0.0  ;;  %v219_v41 = vpop.permute.xlu1 %218 }
  0xc4   :  { %v169_v36 = vadd.f32 %v168_v39, %v167_v38  ;;  %v231_v6 = vsel %vm226_vm4, %v219_v41, 0.0 }
  0xc5   :  { %v232_v13 = vadd.f32 %v231_v6, %v230_v10 }
  0xc6   :  { %v278_v47 = vpop.permute.xlu0 %277  ;;  %170 = vadd.xlane.f32.xlu0 %v169_v36 }
  0xc7   :  { %v288_v51 = vsel %vm224_vm6, %v278_v47, 0.0  ;;  %v280_v52 = vpop.permute.xlu1 %279 }
  0xc8   :  { %v289_v55 = vadd.f32 %v288_v51, %v287_v32  ;;  %v290_v59 = vsel %vm226_vm4, %v280_v52, 0.0 }
  0xca   :  { %v322_v62 = vpop.permute.xlu0 %321  ;;  %132 = vadd.xlane.f32.xlu0 %v131_v56  ;;  %v291_v4 = vadd.f32 %v290_v59, %v289_v55 }
  0xcb   :  { %v327_v0 = vsel %vm128_vm5, %v322_v62, 0.0  ;;  %v324_v1 = vpop.permute.xlu1 %323 }
  0xcc   :  { %v328_v40 = vsel %vm128_vm5, %v324_v1, 0.0 }
  0xcd   :  { %v329_v7 = vadd.f32 %v328_v40, %v327_v0 }
  0xce   :  { %292 = vadd.xlane.f32.xlu0 %v291_v4  ;;  %v367_v9 = vpop.permute.xlu0 %366 }
  0xcf   :  { %330 = vadd.xlane.f32.xlu1 %v329_v7  ;;  %v369_v11 = vpop.permute.xlu1 %368  ;;  %v372_v12 = vsel %vm128_vm5, %v367_v9, 0.0 }
  0xd0   :  { %v373_v15 = vsel %vm128_vm5, %v369_v11, 0.0 }
  0xd1   :  { %v374_v20 = vadd.f32 %v373_v15, %v372_v12 }
  0xd2   :  { %233 = vadd.xlane.f32.xlu0 %v232_v13 }
  0xd3   :  { %255 = vadd.xlane.f32.xlu1 %v254_v16 }
  0xd6   :  { %350 = vadd.xlane.f32.xlu0 %v349_v17 }
  0xd7   :  { %375 = vadd.xlane.f32.xlu1 %v374_v20 }
 0x138   :  { %v148_v22 = vpop.xlane.xlu1 %147 }
 0x139   :  { %v149_v23 = vrot.slane %v148_v22, 4 }
 0x13b   :  { %v150_v21 = vadd.f32 %v149_v23, %v148_v22 }
 0x13d   :  { %v151_v27 = vrot.slane %v150_v21, 2 }
 0x13f   :  { %v152_v35 = vadd.f32 %v151_v27, %v150_v21 }
 0x141   :  { %v153_v45 = vrot.slane %v152_v35, 1 }
 0x143   :  { %v154_v56 = vadd.f32 %v153_v45, %v152_v35 }
 0x153   :  { %v171_v24 = vpop.xlane.xlu0 %170 }
 0x154   :  { %v172_v25 = vrot.slane %v171_v24, 4 }
 0x156   :  { %v173_v26 = vadd.f32 %v172_v25, %v171_v24 }
 0x157   :  { %v133_v28 = vpop.xlane.xlu0 %132 }
 0x158   :  { %v174_v29 = vrot.slane %v173_v26, 2  ;;  %v134_v31 = vrot.slane %v133_v28, 4 }
 0x15a   :  { %v135_v33 = vadd.f32 %v134_v31, %v133_v28  ;;  %v175_v41 = vadd.f32 %v174_v29, %v173_v26 }
 0x15b   :  { %v293_v34 = vpop.xlane.xlu0 %292 }
 0x15c   :  { %v136_v37 = vrot.slane %v135_v33, 2  ;;  %v294_v38 = vrot.slane %v293_v34, 4  ;;  %v331_v39 = vpop.xlane.xlu1 %330  ;;  %v176_v49 = vrot.slane %v175_v41, 1 }
 0x15d   :  { %v332_v42 = vrot.slane %v331_v39, 4 }
 0x15e   :  { %v295_v36 = vadd.f32 %v294_v38, %v293_v34  ;;  %v137_v30 = vadd.f32 %v136_v37, %v135_v33  ;;  %v177_v60 = vadd.f32 %v176_v49, %v175_v41 }
 0x15f   :  { %v333_v43 = vadd.f32 %v332_v42, %v331_v39  ;;  %v234_v44 = vpop.xlane.xlu0 %233 }
 0x160   :  { %v296_v46 = vrot.slane %v295_v36, 2  ;;  %v235_v32 = vrot.slane %v234_v44, 4  ;;  %v256_v47 = vpop.xlane.xlu1 %255  ;;  %v138_v48 = vrot.slane %v137_v30, 1 }
 0x161   :  { %v334_v50 = vrot.slane %v333_v43, 2  ;;  %v257_v51 = vrot.slane %v256_v47, 4 }
 0x162   :  { %v236_v52 = vadd.f32 %v235_v32, %v234_v44  ;;  %v139_v53 = vadd.f32 %v138_v48, %v137_v30  ;;  %v297_v61 = vadd.f32 %v296_v46, %v295_v36 }
 0x163   :  { %v258_v54 = vadd.f32 %v257_v51, %v256_v47  ;;  %v351_v55 = vpop.xlane.xlu0 %350  ;;  %v335_v0 = vadd.f32 %v334_v50, %v333_v43 }
 0x164   :  { %v237_v57 = vrot.slane %v236_v52, 2  ;;  %v352_v58 = vrot.slane %v351_v55, 4  ;;  %v376_v59 = vpop.xlane.xlu1 %375  ;;  %411 = vpush %v139_v53  ;;  %v298_v6 = vrot.slane %v297_v61, 1 }
 0x165   :  { %v259_v62 = vrot.slane %v258_v54, 2  ;;  %v377_v63 = vrot.slane %v376_v59, 4  ;;  %413 = vpush %v154_v56  ;;  %v336_v9 = vrot.slane %v335_v0, 1 }
 0x166   :  { %v353_v1 = vadd.f32 %v352_v58, %v351_v55  ;;  %415 = vpush %v177_v60  ;;  %v238_v2 = vadd.f32 %v237_v57, %v236_v52  ;;  %v299_v14 = vadd.f32 %v298_v6, %v297_v61 }
 0x167   :  { %v378_v3 = vadd.f32 %v377_v63, %v376_v59  ;;  %v260_v40 = vadd.f32 %v259_v62, %v258_v54  ;;  %v337_v16 = vadd.f32 %v336_v9, %v335_v0 }
 0x168   :  { %v354_v4 = vrot.slane %v353_v1, 2  ;;  %v239_v5 = vrot.slane %v238_v2, 1 }
 0x169   :  { %v379_v7 = vrot.slane %v378_v3, 2  ;;  %v261_v8 = vrot.slane %v260_v40, 1 }
 0x16a   :  { %v355_v10 = vadd.f32 %v354_v4, %v353_v1  ;;  %v240_v11 = vadd.f32 %v239_v5, %v238_v2 }
 0x16b   :  { %v380_v12 = vadd.f32 %v379_v7, %v378_v3  ;;  %v262_v13 = vadd.f32 %v261_v8, %v260_v40 }
 0x16c   :  { %417 = vpush %v240_v11  ;;  %v356_v15 = vrot.slane %v355_v10, 1 }
 0x16d   :  { %419 = vpush %v262_v13  ;;  %v381_v18 = vrot.slane %v380_v12, 1 }
 0x16e   :  { %421 = vpush %v299_v14  ;;  %v357_v19 = vadd.f32 %v356_v15, %v355_v10 }
 0x16f   :  { %423 = vpush %v337_v16  ;;  %v382_v20 = vadd.f32 %v381_v18, %v380_v12 }
 0x170   :  { %425 = vpush %v357_v19 }
 0x171   :  { %427 = vpush %v382_v20 }
 0x195   :  { %s412_s8 = spop %411 }
 0x196   :  { %s414_s9 = spop %413 }
 0x197   :  { %s156_s10 = sadd.f32 %s414_s9, %s412_s8  ;;  %s416_s11 = spop %415 }
 0x199   :  { %s179_s16 = sadd.f32 %s416_s11, %s156_s10 }
 0x19d   :  { %s418_s12 = spop %417 }
 0x19e   :  { %s420_s13 = spop %419 }
 0x19f   :  { %s264_s14 = sadd.f32 %s420_s13, %s418_s12  ;;  %s422_s15 = spop %421 }
 0x1a0   :  { %s424_s17 = spop %423 }
 0x1a1   :  { %s301_s18 = sadd.f32 %s422_s15, %s264_s14  ;;  %s426_s19 = spop %425 }
 0x1a2   :  { %s359_s20 = sadd.f32 %s426_s19, %s424_s17  ;;  %s428_s22 = spop %427 }
 0x1a3   :  { %s302_s21 = sadd.f32 %s301_s18, %s179_s16 }
 0x1a4   :  { %s384_s23 = sadd.f32 %s428_s22, %s359_s20 }
 0x1a6   :  { %s385_s24 = sadd.f32 %s384_s23, %s302_s21 }
 0x1a8   :  { %s394_s25 = smul.f32 0.001953125, %s385_s24 }
 0x1aa   :  { %395 = sst [smem:[#allocation7]] %s394_s25 }
 0x1ab   :  { %491 = shalt.err (!%p488_p4)
}
 0x1ac   :  { %s505_s0 = smov [#allocation7]  }
 0x1ad   :  { %403 = dma.smem_to_hbm %s505_s0, 16, %s645_s2, [#allocation4]  }
 0x1ae   :  { %496 = dma.done.wait [#allocation4], 16  }
 0x1af   :  { %497 = vsyncadd [#allocation4], 4294967280 }
 0x1b0   :  { %407 = sfence }
 0x1b1   :  { %408 = vsyncpa [#allocation3], 1 }
 0x1b2   :  { %409 = vsyncpa [#allocation6], 1 }
 0x1b3   :  { %410 = vsyncpa [#allocation4], 1 }

</bundles_post_ra>
